<compile_context>
chip_gen: v5e
topology: v5e:2x2
jax: 0.10.0
libtpu: 0.0.40
codegen_flags: <defaults>
</compile_context>

<pallas_src>
import jax
import jax.numpy as jnp
from jax.experimental import pallas as pl
from jax.experimental.pallas import tpu as pltpu


def model_kernel(x_ref, p_ref, out_ref):
    # x_ref:   (B, 4)  -- x1 flattened over its trailing (2, 2) block (row-major)
    # p_ref:   (5, 4)  -- rows 0..3: folded weight Mt, row 4: folded bias c
    # out_ref: (B, 4)  -- flattened output (reshaped back to (B, 2, 2) outside)
    x = x_ref[...]
    p = p_ref[...]
    kdim = x_ref.shape[1]                  # static (= 4): unrolls at trace time
    acc = p[kdim:kdim + 1, :]              # folded bias row, (1, 4)
    for q in range(kdim):                  # pure VPU: unrolled K, no XLU reduce
        acc = acc + x[:, q:q + 1] * p[q:q + 1, :]
    out_ref[...] = acc


@jax.jit
def model_forward(x1, x2, w, b):
    del x2  # x2 does not affect the returned value of Model.forward
    B, R, C = x1.shape          # (3, 2, 2); C == in_features
    J = w.shape[0]              # out_features == 2 (module requires R == in_features)

    # --- parameter prep (plain JAX, folds both linears + bias) -----------------
    # M[(i*2+j), (k*2+m)] = w[i, m] * w[j, k]
    M = jnp.einsum("im,jk->ijkm", w, w).reshape(J * J, R * C)
    # c[i*2+j] = b[i] * sum_k w[j, k] + b[j]
    c = (b[:, None] * jnp.sum(w, axis=1)[None, :] + b[None, :]).reshape(1, J * J)
    params = jnp.concatenate([M.T, c], axis=0).astype(jnp.float32)   # (5, 4)
    x_flat = x1.reshape(B, R * C).astype(jnp.float32)                # (3, 4): one lane tile

    out_flat = pl.pallas_call(
        model_kernel,
        out_shape=jax.ShapeDtypeStruct((B, J * J), jnp.float32),
        in_specs=[
            pl.BlockSpec(memory_space=pltpu.MemorySpace.VMEM),   # x_flat  (one tile)
            pl.BlockSpec(memory_space=pltpu.MemorySpace.VMEM),   # params  (one tile)
        ],
        out_specs=pl.BlockSpec(memory_space=pltpu.MemorySpace.VMEM),
        cost_estimate=pl.CostEstimate(
            flops=2 * B * (R * C) * (J * J),
            transcendentals=0,
            bytes_accessed=4 * (B * R * C + (R * C + 1) * J * J + B * J * J),
        ),
    )(x_flat, params)

    return out_flat.reshape(B, J, J)


if __name__ == "__main__":
    key = jax.random.PRNGKey(0)
    k1, k2, kw, kb = jax.random.split(key, 4)

    # Inputs matching the module's shapes.
    x1 = jax.random.normal(k1, (3, 2, 2), dtype=jnp.float32)
    x2 = jax.random.normal(k2, (3, 2, 2), dtype=jnp.float32)

    # Deterministic Linear(2, 2) parameters (PyTorch default: U(-1/sqrt(in), 1/sqrt(in))).
    bound = float(1.0 / jnp.sqrt(2.0))
    w = jax.random.uniform(kw, (2, 2), minval=-bound, maxval=bound, dtype=jnp.float32)
    b = jax.random.uniform(kb, (2,), minval=-bound, maxval=bound, dtype=jnp.float32)

    out = model_forward(x1, x2, w, b)
    out = jax.block_until_ready(out)

    # Pure-JAX reference following the original (unfused) module exactly.
    v5 = jnp.einsum("brm,im->bri", x1, w) + b
    v4 = jnp.transpose(v5, (0, 2, 1))
    v3 = jnp.einsum("bik,jk->bij", v4, w) + b
    ref = v3  # the two trailing permutes cancel

    assert out.shape == (3, 2, 2) and out.dtype == jnp.float32
    assert jnp.allclose(out, ref, atol=1e-5, rtol=1e-5)
    print("KERNEL_OK")
</pallas_src>

<mosaic_0001>
module attributes {stable_mosaic.version = 11 : i64} {
  func.func @model_kernel(%arg0: memref<3x4xf32, #tpu.memory_space<vmem>>, %arg1: memref<5x4xf32, #tpu.memory_space<vmem>>, %arg2: memref<3x4xf32, #tpu.memory_space<vmem>>) attributes {dimension_semantics = [], scalar_prefetch = 0 : i64, scratch_operands = 0 : i64, tpu.core_type = #tpu.core_type<tc>} {
    %c0 = arith.constant 0 : index
    %c0_0 = arith.constant 0 : index
    %0 = vector.load %arg0[%c0, %c0_0] : memref<3x4xf32, #tpu.memory_space<vmem>>, vector<3x4xf32>
    %c0_1 = arith.constant 0 : index
    %c0_2 = arith.constant 0 : index
    %1 = vector.load %arg1[%c0_1, %c0_2] : memref<5x4xf32, #tpu.memory_space<vmem>>, vector<5x4xf32>
    %2 = vector.extract_strided_slice %1 {offsets = [4, 0], sizes = [1, 4], strides = [1, 1]} : vector<5x4xf32> to vector<1x4xf32>
    %3 = vector.extract_strided_slice %0 {offsets = [0, 0], sizes = [3, 1], strides = [1, 1]} : vector<3x4xf32> to vector<3x1xf32>
    %4 = vector.extract_strided_slice %1 {offsets = [0, 0], sizes = [1, 4], strides = [1, 1]} : vector<5x4xf32> to vector<1x4xf32>
    %5 = vector.broadcast %3 : vector<3x1xf32> to vector<3x4xf32>
    %6 = vector.broadcast %4 : vector<1x4xf32> to vector<3x4xf32>
    %7 = arith.mulf %5, %6 : vector<3x4xf32>
    %8 = vector.broadcast %2 : vector<1x4xf32> to vector<3x4xf32>
    %9 = arith.addf %8, %7 : vector<3x4xf32>
    %10 = vector.extract_strided_slice %0 {offsets = [0, 1], sizes = [3, 1], strides = [1, 1]} : vector<3x4xf32> to vector<3x1xf32>
    %11 = vector.extract_strided_slice %1 {offsets = [1, 0], sizes = [1, 4], strides = [1, 1]} : vector<5x4xf32> to vector<1x4xf32>
    %12 = vector.broadcast %10 : vector<3x1xf32> to vector<3x4xf32>
    %13 = vector.broadcast %11 : vector<1x4xf32> to vector<3x4xf32>
    %14 = arith.mulf %12, %13 : vector<3x4xf32>
    %15 = arith.addf %9, %14 : vector<3x4xf32>
    %16 = vector.extract_strided_slice %0 {offsets = [0, 2], sizes = [3, 1], strides = [1, 1]} : vector<3x4xf32> to vector<3x1xf32>
    %17 = vector.extract_strided_slice %1 {offsets = [2, 0], sizes = [1, 4], strides = [1, 1]} : vector<5x4xf32> to vector<1x4xf32>
    %18 = vector.broadcast %16 : vector<3x1xf32> to vector<3x4xf32>
    %19 = vector.broadcast %17 : vector<1x4xf32> to vector<3x4xf32>
    %20 = arith.mulf %18, %19 : vector<3x4xf32>
    %21 = arith.addf %15, %20 : vector<3x4xf32>
    %22 = vector.extract_strided_slice %0 {offsets = [0, 3], sizes = [3, 1], strides = [1, 1]} : vector<3x4xf32> to vector<3x1xf32>
    %23 = vector.extract_strided_slice %1 {offsets = [3, 0], sizes = [1, 4], strides = [1, 1]} : vector<5x4xf32> to vector<1x4xf32>
    %24 = vector.broadcast %22 : vector<3x1xf32> to vector<3x4xf32>
    %25 = vector.broadcast %23 : vector<1x4xf32> to vector<3x4xf32>
    %26 = arith.mulf %24, %25 : vector<3x4xf32>
    %27 = arith.addf %21, %26 : vector<3x4xf32>
    %c0_3 = arith.constant 0 : index
    %c0_4 = arith.constant 0 : index
    %28 = vector.load %arg2[%c0_3, %c0_4] : memref<3x4xf32, #tpu.memory_space<vmem>>, vector<3x4xf32>
    tpu.vector_store %arg2[%c0_3, %c0_4], %27 {strides = array<i32>} : memref<3x4xf32, #tpu.memory_space<vmem>>, vector<3x4xf32>,
    return
  }
}

</mosaic_0001>

<bundles_post_ra>
// kernel: model_forward.1
= control target key start
LH: loop header
LB: loop body
LE: loop exit
PB: predicated region body
PF: predicated region fallthrough
CT: control target
= control target key end

     0   :  { %v58_v0 = vmov 0   ;;  %v59_v2 = vmov 2   ;;  %v60_v3 = vmov 1   ;;  %v61_v4 = vmov 3   ;;  %s86_s0 = inlined_call_operand.vmem [shape: f32[3,4], index: 0, kind: input, shape index: {}]   ;;  %s87_s1 = inlined_call_operand.vmem [shape: f32[5,4], index: 1, kind: input, shape index: {}]   ;;  %s88_s2 = inlined_call_operand.vmem [shape: f32[3,4], index: 2, kind: output, shape index: {}]  }
   0x1   :  { %53 = vset.pattern.permute.xlu0 %v58_v0  ;;  %v11_v1 = vld [vmem:[%s86_s0] sm:$0x7]  ;;  %55 = vset.pattern.permute.xlu1 %v59_v2  ;;  %vm43_vm0 = vcmask 26624  }
   0x2   :  { %15 = vperm.xlu0 %53, %v11_v1   ;;  %30 = vperm.xlu1 %55, %v11_v1   ;;  %v12_v5 = vld [vmem:[%s87_s1] sm:$0x1f] }
   0x3   :  { %v18_v8 = vperm.slane %v12_v5, 0  ;;  %v20_v9 = vperm.slane %v12_v5, 4  ;;  %v26_v11 = vperm.slane %v12_v5, 1  ;;  %v33_v12 = vperm.slane %v12_v5, 2 }
   0x4   :  { %v40_v13 = vperm.slane %v12_v5, 3 }
   0xa   :  { %54 = vset.pattern.permute.xlu0 %v60_v3  ;;  %56 = vset.pattern.permute.xlu1 %v61_v4 }
   0xb   :  { %23 = vperm.xlu0 %54, %v11_v1   ;;  %37 = vperm.xlu1 %56, %v11_v1  }
  0x13   :  { %57 = vset.pattern.permute.xlu0 %v61_v4 }
  0x74   :  { %v16_v6 = vpop.permute.xlu0 %15  ;;  %v31_v7 = vpop.permute.xlu1 %30 }
  0x75   :  { %v19_v10 = vmul.f32 %v18_v8, %v16_v6  ;;  %v34_v18 = vmul.f32 %v33_v12, %v31_v7 }
  0x77   :  { %v21_v16 = vadd.f32 %v20_v9, %v19_v10 }
  0x7d   :  { %v24_v14 = vpop.permute.xlu0 %23  ;;  %v38_v15 = vpop.permute.xlu1 %37 }
  0x7e   :  { %v27_v17 = vmul.f32 %v26_v11, %v24_v14  ;;  %v41_v20 = vmul.f32 %v40_v13, %v38_v15 }
  0x80   :  { %v28_v19 = vadd.f32 %v27_v17, %v21_v16 }
  0x82   :  { %v35_v21 = vadd.f32 %v34_v18, %v28_v19 }
  0x84   :  { %v42_v22 = vadd.f32 %v41_v20, %v35_v21 }
  0x86   :  { %44 = vst.msk [vmem:[%s88_s2] sm:$0x7] %vm43_vm0, %v42_v22 }

</bundles_post_ra>
